<compile_context>
chip_gen: v7x
topology: tpu7x:2x2x1
jax: 0.10.0
libtpu: 0.0.40
codegen_flags: <defaults>
</compile_context>

<pallas_src>
import functools
import math

import jax
import jax.numpy as jnp
from jax.experimental import pallas as pl
from jax.experimental.pallas import tpu as pltpu


def _mlp_resident_kernel(x_ref, w1_ref, b1_ref, w2_ref, b2_ref, o_ref, *,
                         mm_dtype, precision):
    """Fully fused step: whole fc1/fc2 weights resident, one batch tile."""
    h = jnp.dot(x_ref[...], w1_ref[...],
                preferred_element_type=jnp.float32, precision=precision)
    h = jnp.maximum(h + b1_ref[...], 0.0).astype(mm_dtype)
    y = jnp.dot(h, w2_ref[...],
                preferred_element_type=jnp.float32, precision=precision)
    o_ref[...] = jnp.maximum(y + b2_ref[...], 0.0).astype(o_ref.dtype)


def _mlp_tiled_kernel(x_ref, w1_ref, b1_ref, w2_ref, b2_ref, o_ref, h_ref, *,
                      precision):
    """One (batch-tile i, fc2-output-tile j) step; fc1 cached in VMEM scratch."""
    @pl.when(pl.program_id(1) == 0)
    def _():
        h = jnp.dot(x_ref[...], w1_ref[...],
                    preferred_element_type=jnp.float32, precision=precision)
        h_ref[...] = jnp.maximum(h + b1_ref[...], 0.0).astype(h_ref.dtype)

    y = jnp.dot(h_ref[...], w2_ref[...],
                preferred_element_type=jnp.float32, precision=precision)
    o_ref[...] = jnp.maximum(y + b2_ref[...], 0.0).astype(o_ref.dtype)


def _pick_tile(dim, max_tile):
    """Largest divisor of `dim` <= max_tile, preferring 128- then 8-multiples."""
    max_tile = max(1, min(int(dim), int(max_tile)))
    if dim <= max_tile:
        return dim
    best_any, best_8, best_128 = 1, None, None
    for d in range(1, max_tile + 1):
        if dim % d:
            continue
        best_any = d
        if d % 8 == 0:
            best_8 = d
        if d % 128 == 0:
            best_128 = d
    return best_128 or best_8 or best_any


def _make_spec(block_shape, index_map, buffer_count=None):
    """BlockSpec, optionally with explicit buffer count (safe fallback)."""
    if buffer_count is not None:
        try:
            return pl.BlockSpec(block_shape, index_map,
                                pipeline_mode=pl.Buffered(buffer_count))
        except Exception:
            pass
    return pl.BlockSpec(block_shape, index_map)


def _vmem_budget_bytes():
    """~80% of this generation's VMEM capacity (v5e/v6e 128 MiB, v7x 64 MiB)."""
    try:
        cap = int(pltpu.get_tpu_info().vmem_capacity_bytes)
    except Exception:
        cap = 64 * 1024 * 1024  # conservative fallback (v7x per-core VMEM)
    return min(max(int(0.8 * cap), 32 * 1024 * 1024), 112 * 1024 * 1024)


def mlp_block_forward(x, w1, b1, w2, b2, *, block_b=None, block_n=None,
                      compute_dtype="auto", out_dtype=None,
                      force_tiled_n=False):
    """relu(relu(x @ w1 + b1) @ w2 + b2).

    x: (B, input_dim); w1: (input_dim, hidden); w2: (hidden, hidden).
    compute_dtype: matmul-operand dtype ("auto" -> bf16 for f32 inputs).
    Accumulation, bias add and ReLU are always f32.  Output dtype defaults
    to x.dtype (pass out_dtype=jnp.bfloat16 to halve output HBM traffic).
    """
    B, input_dim = x.shape
    hidden = w1.shape[1]
    assert w1.shape == (input_dim, hidden)
    assert w2.shape == (hidden, hidden)
    if out_dtype is None:
        out_dtype = x.dtype

    if isinstance(compute_dtype, str) and compute_dtype == "auto":
        compute_dtype = (jnp.bfloat16 if jnp.dtype(x.dtype) == jnp.float32
                         else x.dtype)
    compute_dtype = jnp.dtype(compute_dtype)
    mm_isz = compute_dtype.itemsize
    out_isz = jnp.dtype(out_dtype).itemsize
    # Exact f32 matmul semantics when requested (preferred_element_type only
    # controls the accumulator, not the operand passes).
    precision = (jax.lax.Precision.HIGHEST
                 if compute_dtype == jnp.dtype(jnp.float32) else None)

    x_mm = x.astype(compute_dtype)
    w1_mm = w1.astype(compute_dtype)
    w2_mm = w2.astype(compute_dtype)
    # Biases: f32, (1, hidden) — cast/reshape hoisted out of the kernel.
    b1_2d = b1.astype(jnp.float32).reshape(1, hidden)
    b2_2d = b2.astype(jnp.float32).reshape(1, hidden)

    vmem_budget = _vmem_budget_bytes()

    # Batch-tile target: the fc2 matmul's per-step arithmetic intensity is
    # ~block_b FLOP/byte, so 512 (768 on 128 MiB-VMEM / v6e-class parts) keeps
    # the MXU compute-bound instead of w2-stream bound.
    if block_b is None:
        bb_target = 768 if vmem_budget > 80 * 1024 * 1024 else 512
        if mm_isz >= 4:
            bb_target //= 2
    else:
        bb_target = block_b

    out_shape = jax.ShapeDtypeStruct((B, hidden), out_dtype)

    def _build(single_buffer_weights):
        wbuf = 1 if single_buffer_weights else 2
        wcount = 1 if single_buffer_weights else None

        # ---- Path A: both weight matrices resident, 1-D grid over batch. ----
        w_bytes_a = wbuf * ((input_dim * hidden + hidden * hidden) * mm_isz
                            + 2 * hidden * 4)
        per_row_a = (2 * input_dim * mm_isz      # x tile (double buffered)
                     + 2 * hidden * out_isz      # out tile (double buffered)
                     + hidden * (8 + mm_isz))    # f32 fc1/fc2 temps + cast h
        rem_a = vmem_budget - w_bytes_a
        max_bb_a = rem_a // per_row_a if rem_a > 0 else 0
        use_resident = (not force_tiled_n) and max_bb_a >= min(B, 128)

        if use_resident:
            bb = _pick_tile(B, min(bb_target, max_bb_a))
            grid = (B // bb,)
            kernel = functools.partial(_mlp_resident_kernel,
                                       mm_dtype=compute_dtype,
                                       precision=precision)
            in_specs = [
                pl.BlockSpec((bb, input_dim), lambda i: (i, 0)),            # x
                _make_spec((input_dim, hidden), lambda i: (0, 0), wcount),  # w1
                _make_spec((1, hidden), lambda i: (0, 0), wcount),          # b1
                _make_spec((hidden, hidden), lambda i: (0, 0), wcount),     # w2
                _make_spec((1, hidden), lambda i: (0, 0), wcount),          # b2
            ]
            out_spec = pl.BlockSpec((bb, hidden), lambda i: (i, 0))
            scratch = []
            dims = ("parallel",)
            # NOTE: for decode-like B/bb <= 2 on v7x, a core-parallel split of
            # the fc2 N axis (each core recomputing its fc1 slice) would use
            # both TensorCores; not needed for these shapes.
        else:
            # ---- Path B: stream w2 in N tiles, fc1 cached in VMEM scratch. --
            bn = _pick_tile(hidden, block_n if block_n is not None else 512)
            fixed_b = (wbuf * (input_dim * hidden * mm_isz + hidden * 4)  # w1,b1
                       + 2 * (hidden * bn * mm_isz + bn * 4))             # w2,b2
            per_row_b = (2 * input_dim * mm_isz        # x tile
                         + 2 * bn * out_isz            # out tile
                         + hidden * (4 + mm_isz)       # f32 fc1 temp + h scratch
                         + bn * 8)                     # f32 fc2 temp
            rem_b = vmem_budget - fixed_b
            max_bb_b = max(rem_b // per_row_b, 8) if rem_b > 0 else 8
            bb = _pick_tile(B, min(bb_target, max_bb_b))
            grid = (B // bb, hidden // bn)
            kernel = functools.partial(_mlp_tiled_kernel, precision=precision)
            in_specs = [
                pl.BlockSpec((bb, input_dim), lambda i, j: (i, 0)),            # x
                _make_spec((input_dim, hidden), lambda i, j: (0, 0), wcount),  # w1
                _make_spec((1, hidden), lambda i, j: (0, 0), wcount),          # b1
                pl.BlockSpec((hidden, bn), lambda i, j: (0, j)),               # w2
                pl.BlockSpec((1, bn), lambda i, j: (0, j)),                    # b2
            ]
            out_spec = pl.BlockSpec((bb, bn), lambda i, j: (i, j))
            scratch = [pltpu.VMEM((bb, hidden), compute_dtype)]                # h
            dims = ("parallel", "arbitrary")

        return pl.pallas_call(
            kernel,
            out_shape=out_shape,
            grid_spec=pltpu.PrefetchScalarGridSpec(
                num_scalar_prefetch=0,
                grid=grid,
                in_specs=in_specs,
                out_specs=out_spec,
                scratch_shapes=scratch),
            compiler_params=pltpu.CompilerParams(
                dimension_semantics=dims,
                vmem_limit_bytes=vmem_budget),
        )

    # Prefer single-buffered resident weights; if this jax/Mosaic build rejects
    # pl.Buffered(1), retry with default double buffering.
    try:
        return _build(True)(x_mm, w1_mm, b1_2d, w2_mm, b2_2d)
    except Exception:
        return _build(False)(x_mm, w1_mm, b1_2d, w2_mm, b2_2d)


def init_mlp_params(key, input_dim, hidden_dim, dtype=jnp.float32):
    """Orthogonal init with gain sqrt(2), zero biases (mirrors orthogonal_init_)."""
    k1, k2 = jax.random.split(key)
    ortho = jax.nn.initializers.orthogonal(scale=math.sqrt(2))
    # Stored as (in, out) so forward is x @ W + b (== x @ W_pt.T + b).
    w1 = ortho(k1, (input_dim, hidden_dim), dtype)
    w2 = ortho(k2, (hidden_dim, hidden_dim), dtype)
    b1 = jnp.zeros((hidden_dim,), dtype)
    b2 = jnp.zeros((hidden_dim,), dtype)
    return w1, b1, w2, b2


if __name__ == "__main__":
    key = jax.random.PRNGKey(0)

    # ---- Test 1: small spec-like shapes, exact f32 path ---------------------
    input_dim, hidden_dim, batch = 16, 32, 8
    kx, kp, key = jax.random.split(key, 3)
    x = jax.random.normal(kx, (batch, input_dim), jnp.float32)
    w1, b1, w2, b2 = init_mlp_params(kp, input_dim, hidden_dim, jnp.float32)

    out = jax.block_until_ready(
        mlp_block_forward(x, w1, b1, w2, b2, compute_dtype=jnp.float32))
    hp = jax.lax.Precision.HIGHEST
    ref = jnp.maximum(
        jnp.dot(jnp.maximum(jnp.dot(x, w1, precision=hp) + b1, 0.0), w2,
                precision=hp) + b2, 0.0)
    assert out.shape == (batch, hidden_dim)
    assert jnp.allclose(out, ref, atol=1e-4, rtol=1e-4)

    # ---- Test 2: resident-weights fast path, default bf16 operands ----------
    input_dim2, hidden_dim2, batch2 = 128, 256, 256
    kx2, kp2 = jax.random.split(key)
    x2 = jax.random.normal(kx2, (batch2, input_dim2), jnp.float32)
    w1_, b1_, w2_, b2_ = init_mlp_params(kp2, input_dim2, hidden_dim2,
                                         jnp.float32)
    out2 = jax.block_until_ready(mlp_block_forward(x2, w1_, b1_, w2_, b2_))

    xb, w1b, w2b = (a.astype(jnp.bfloat16) for a in (x2, w1_, w2_))
    h_ref = jnp.maximum(
        jnp.dot(xb, w1b, preferred_element_type=jnp.float32) + b1_, 0.0
    ).astype(jnp.bfloat16)
    ref2 = jnp.maximum(
        jnp.dot(h_ref, w2b, preferred_element_type=jnp.float32) + b2_, 0.0
    ).astype(x2.dtype)
    assert out2.shape == (batch2, hidden_dim2)
    assert jnp.allclose(out2, ref2, atol=2e-2, rtol=2e-2)

    # ---- Test 3: forced tiled-N fallback path (multi-step 2-D grid) ---------
    out3 = jax.block_until_ready(
        mlp_block_forward(x2, w1_, b1_, w2_, b2_, block_b=128, block_n=128,
                          force_tiled_n=True))
    assert jnp.allclose(out3, ref2, atol=2e-2, rtol=2e-2)

    print("KERNEL_OK")
</pallas_src>

<mosaic_0001>
module attributes {stable_mosaic.version = 11 : i64} {
  func.func @_mlp_resident_kernel(%arg0: i32, %arg1: memref<8x16xf32, #tpu.memory_space<vmem>>, %arg2: memref<16x32xf32, #tpu.memory_space<vmem>>, %arg3: memref<1x32xf32, #tpu.memory_space<vmem>>, %arg4: memref<32x32xf32, #tpu.memory_space<vmem>>, %arg5: memref<1x32xf32, #tpu.memory_space<vmem>>, %arg6: memref<8x32xf32, #tpu.memory_space<vmem>>) attributes {dimension_semantics = [#tpu.dimension_semantics<parallel>], iteration_bounds = array<i64: 1>, scalar_prefetch = 0 : i64, scratch_operands = 0 : i64, tpu.core_type = #tpu.core_type<tc>, window_params = [{transform_indices = @transform_0, window_bounds = array<i64: 8, 16>}, {pipeline_mode = #tpu.pipeline_mode<synchronous>, transform_indices = @transform_1, window_bounds = array<i64: 16, 32>}, {pipeline_mode = #tpu.pipeline_mode<synchronous>, transform_indices = @transform_2, window_bounds = array<i64: 1, 32>}, {pipeline_mode = #tpu.pipeline_mode<synchronous>, transform_indices = @transform_3, window_bounds = array<i64: 32, 32>}, {pipeline_mode = #tpu.pipeline_mode<synchronous>, transform_indices = @transform_4, window_bounds = array<i64: 1, 32>}, {transform_indices = @transform_5, window_bounds = array<i64: 8, 32>}]} {
    %c0 = arith.constant 0 : index
    %c0_0 = arith.constant 0 : index
    %0 = vector.load %arg1[%c0, %c0_0] : memref<8x16xf32, #tpu.memory_space<vmem>>, vector<8x16xf32>
    %c0_1 = arith.constant 0 : index
    %c0_2 = arith.constant 0 : index
    %1 = vector.load %arg2[%c0_1, %c0_2] : memref<16x32xf32, #tpu.memory_space<vmem>>, vector<16x32xf32>
    %cst = arith.constant dense<0.000000e+00> : vector<8x32xf32>
    %2 = tpu.matmul %0, %1, %cst {dimension_numbers = #tpu.dot_dimension_numbers<[1], [0], [0], [1], [0, 0, 1, 1], [], []>, precision = #tpu.contract_precision<fp32>} : vector<8x16xf32>, vector<16x32xf32>, vector<8x32xf32> -> vector<8x32xf32>
    %c0_3 = arith.constant 0 : index
    %c0_4 = arith.constant 0 : index
    %3 = vector.load %arg3[%c0_3, %c0_4] : memref<1x32xf32, #tpu.memory_space<vmem>>, vector<1x32xf32>
    %4 = vector.broadcast %3 : vector<1x32xf32> to vector<8x32xf32>
    %5 = arith.addf %2, %4 : vector<8x32xf32>
    %cst_5 = arith.constant 0.000000e+00 : f32
    %6 = vector.broadcast %cst_5 : f32 to vector<8x32xf32>
    %7 = arith.maximumf %5, %6 : vector<8x32xf32>
    %c0_6 = arith.constant 0 : index
    %c0_7 = arith.constant 0 : index
    %8 = vector.load %arg4[%c0_6, %c0_7] : memref<32x32xf32, #tpu.memory_space<vmem>>, vector<32x32xf32>
    %cst_8 = arith.constant dense<0.000000e+00> : vector<8x32xf32>
    %9 = tpu.matmul %7, %8, %cst_8 {dimension_numbers = #tpu.dot_dimension_numbers<[1], [0], [0], [1], [0, 0, 1, 1], [], []>, precision = #tpu.contract_precision<fp32>} : vector<8x32xf32>, vector<32x32xf32>, vector<8x32xf32> -> vector<8x32xf32>
    %c0_9 = arith.constant 0 : index
    %c0_10 = arith.constant 0 : index
    %10 = vector.load %arg5[%c0_9, %c0_10] : memref<1x32xf32, #tpu.memory_space<vmem>>, vector<1x32xf32>
    %11 = vector.broadcast %10 : vector<1x32xf32> to vector<8x32xf32>
    %12 = arith.addf %9, %11 : vector<8x32xf32>
    %cst_11 = arith.constant 0.000000e+00 : f32
    %13 = vector.broadcast %cst_11 : f32 to vector<8x32xf32>
    %14 = arith.maximumf %12, %13 : vector<8x32xf32>
    %c0_12 = arith.constant 0 : index
    %c0_13 = arith.constant 0 : index
    %15 = vector.load %arg6[%c0_12, %c0_13] : memref<8x32xf32, #tpu.memory_space<vmem>>, vector<8x32xf32>
    tpu.vector_store %arg6[%c0_12, %c0_13], %14 {strides = array<i32>} : memref<8x32xf32, #tpu.memory_space<vmem>>, vector<8x32xf32>,
    return
  }
  func.func @transform_0(%arg0: i32) -> (i32, i32) {
    %c0_i32 = arith.constant 0 : i32
    %c0_i32_0 = arith.constant 0 : i32
    return %arg0, %c0_i32 : i32, i32
  }
  func.func @transform_1(%arg0: i32) -> (i32, i32) {
    %c0_i32 = arith.constant 0 : i32
    %c0_i32_0 = arith.constant 0 : i32
    %c0_i32_1 = arith.constant 0 : i32
    return %c0_i32, %c0_i32_0 : i32, i32
  }
  func.func @transform_2(%arg0: i32) -> (i32, i32) {
    %c0_i32 = arith.constant 0 : i32
    %c0_i32_0 = arith.constant 0 : i32
    %c0_i32_1 = arith.constant 0 : i32
    return %c0_i32, %c0_i32_0 : i32, i32
  }
  func.func @transform_3(%arg0: i32) -> (i32, i32) {
    %c0_i32 = arith.constant 0 : i32
    %c0_i32_0 = arith.constant 0 : i32
    %c0_i32_1 = arith.constant 0 : i32
    return %c0_i32, %c0_i32_0 : i32, i32
  }
  func.func @transform_4(%arg0: i32) -> (i32, i32) {
    %c0_i32 = arith.constant 0 : i32
    %c0_i32_0 = arith.constant 0 : i32
    %c0_i32_1 = arith.constant 0 : i32
    return %c0_i32, %c0_i32_0 : i32, i32
  }
  func.func @transform_5(%arg0: i32) -> (i32, i32) {
    %c0_i32 = arith.constant 0 : i32
    %c0_i32_0 = arith.constant 0 : i32
    return %arg0, %c0_i32 : i32, i32
  }
}

module attributes {stable_mosaic.version = 11 : i64} {
  func.func @_mlp_resident_kernel(%arg0: i32, %arg1: memref<8x16xf32, #tpu.memory_space<vmem>>, %arg2: memref<16x32xf32, #tpu.memory_space<vmem>>, %arg3: memref<1x32xf32, #tpu.memory_space<vmem>>, %arg4: memref<32x32xf32, #tpu.memory_space<vmem>>, %arg5: memref<1x32xf32, #tpu.memory_space<vmem>>, %arg6: memref<8x32xf32, #tpu.memory_space<vmem>>) attributes {dimension_semantics = [#tpu.dimension_semantics<parallel>], iteration_bounds = array<i64: 1>, scalar_prefetch = 0 : i64, scratch_operands = 0 : i64, tpu.core_type = #tpu.core_type<tc>, window_params = [{transform_indices = @transform_0, window_bounds = array<i64: 8, 16>}, {pipeline_mode = #tpu.pipeline_mode<synchronous>, transform_indices = @transform_1, window_bounds = array<i64: 16, 32>}, {pipeline_mode = #tpu.pipeline_mode<synchronous>, transform_indices = @transform_2, window_bounds = array<i64: 1, 32>}, {pipeline_mode = #tpu.pipeline_mode<synchronous>, transform_indices = @transform_3, window_bounds = array<i64: 32, 32>}, {pipeline_mode = #tpu.pipeline_mode<synchronous>, transform_indices = @transform_4, window_bounds = array<i64: 1, 32>}, {transform_indices = @transform_5, window_bounds = array<i64: 8, 32>}]} {
    %c0 = arith.constant 0 : index
    %c0_0 = arith.constant 0 : index
    %0 = vector.load %arg1[%c0, %c0_0] : memref<8x16xf32, #tpu.memory_space<vmem>>, vector<8x16xf32>
    %c0_1 = arith.constant 0 : index
    %c0_2 = arith.constant 0 : index
    %1 = vector.load %arg2[%c0_1, %c0_2] : memref<16x32xf32, #tpu.memory_space<vmem>>, vector<16x32xf32>
    %cst = arith.constant dense<0.000000e+00> : vector<8x32xf32>
    %2 = tpu.matmul %0, %1, %cst {dimension_numbers = #tpu.dot_dimension_numbers<[1], [0], [0], [1], [0, 0, 1, 1], [], []>, precision = #tpu.contract_precision<fp32>} : vector<8x16xf32>, vector<16x32xf32>, vector<8x32xf32> -> vector<8x32xf32>
    %c0_3 = arith.constant 0 : index
    %c0_4 = arith.constant 0 : index
    %3 = vector.load %arg3[%c0_3, %c0_4] : memref<1x32xf32, #tpu.memory_space<vmem>>, vector<1x32xf32>
    %4 = vector.broadcast %3 : vector<1x32xf32> to vector<8x32xf32>
    %5 = arith.addf %2, %4 : vector<8x32xf32>
    %cst_5 = arith.constant 0.000000e+00 : f32
    %6 = vector.broadcast %cst_5 : f32 to vector<8x32xf32>
    %7 = arith.maximumf %5, %6 : vector<8x32xf32>
    %c0_6 = arith.constant 0 : index
    %c0_7 = arith.constant 0 : index
    %8 = vector.load %arg4[%c0_6, %c0_7] : memref<32x32xf32, #tpu.memory_space<vmem>>, vector<32x32xf32>
    %cst_8 = arith.constant dense<0.000000e+00> : vector<8x32xf32>
    %9 = tpu.matmul %7, %8, %cst_8 {dimension_numbers = #tpu.dot_dimension_numbers<[1], [0], [0], [1], [0, 0, 1, 1], [], []>, precision = #tpu.contract_precision<fp32>} : vector<8x32xf32>, vector<32x32xf32>, vector<8x32xf32> -> vector<8x32xf32>
    %c0_9 = arith.constant 0 : index
    %c0_10 = arith.constant 0 : index
    %10 = vector.load %arg5[%c0_9, %c0_10] : memref<1x32xf32, #tpu.memory_space<vmem>>, vector<1x32xf32>
    %11 = vector.broadcast %10 : vector<1x32xf32> to vector<8x32xf32>
    %12 = arith.addf %9, %11 : vector<8x32xf32>
    %cst_11 = arith.constant 0.000000e+00 : f32
    %13 = vector.broadcast %cst_11 : f32 to vector<8x32xf32>
    %14 = arith.maximumf %12, %13 : vector<8x32xf32>
    %c0_12 = arith.constant 0 : index
    %c0_13 = arith.constant 0 : index
    %15 = vector.load %arg6[%c0_12, %c0_13] : memref<8x32xf32, #tpu.memory_space<vmem>>, vector<8x32xf32>
    tpu.vector_store %arg6[%c0_12, %c0_13], %14 {strides = array<i32>} : memref<8x32xf32, #tpu.memory_space<vmem>>, vector<8x32xf32>,
    return
  }
  func.func @transform_0(%arg0: i32) -> (i32, i32) {
    %c0_i32 = arith.constant 0 : i32
    %c0_i32_0 = arith.constant 0 : i32
    return %arg0, %c0_i32 : i32, i32
  }
  func.func @transform_1(%arg0: i32) -> (i32, i32) {
    %c0_i32 = arith.constant 0 : i32
    %c0_i32_0 = arith.constant 0 : i32
    %c0_i32_1 = arith.constant 0 : i32
    return %c0_i32, %c0_i32_0 : i32, i32
  }
  func.func @transform_2(%arg0: i32) -> (i32, i32) {
    %c0_i32 = arith.constant 0 : i32
    %c0_i32_0 = arith.constant 0 : i32
    %c0_i32_1 = arith.constant 0 : i32
    return %c0_i32, %c0_i32_0 : i32, i32
  }
  func.func @transform_3(%arg0: i32) -> (i32, i32) {
    %c0_i32 = arith.constant 0 : i32
    %c0_i32_0 = arith.constant 0 : i32
    %c0_i32_1 = arith.constant 0 : i32
    return %c0_i32, %c0_i32_0 : i32, i32
  }
  func.func @transform_4(%arg0: i32) -> (i32, i32) {
    %c0_i32 = arith.constant 0 : i32
    %c0_i32_0 = arith.constant 0 : i32
    %c0_i32_1 = arith.constant 0 : i32
    return %c0_i32, %c0_i32_0 : i32, i32
  }
  func.func @transform_5(%arg0: i32) -> (i32, i32) {
    %c0_i32 = arith.constant 0 : i32
    %c0_i32_0 = arith.constant 0 : i32
    return %arg0, %c0_i32 : i32, i32
  }
}

</mosaic_0001>

<bundles_post_ra>
// kernel: tpu_custom_call.1
= control target key start
LH: loop header
LB: loop body
LE: loop exit
PB: predicated region body
PF: predicated region fallthrough
CT: control target
= control target key end

     0   :  { %10 = vsyncpa [#allocation3], 0  ;;  %s1531_s0 = inlined_call_operand.hbm [shape: f32[8,16], index: 0, kind: input, shape index: {}]   ;;  %s1532_s1 = inlined_call_operand.hbm [shape: f32[16,32], index: 1, kind: input, shape index: {}]   ;;  %s1533_s2 = inlined_call_operand.vmem [shape: f32[1,32], index: 2, kind: input, shape index: {}]   ;;  %s1534_s3 = inlined_call_operand.hbm [shape: f32[32,32], index: 3, kind: input, shape index: {}]   ;;  %s1535_s4 = inlined_call_operand.vmem [shape: f32[1,32], index: 4, kind: input, shape index: {}]   ;;  %s1536_s5 = inlined_call_operand.hbm [shape: f32[8,32], index: 5, kind: output, shape index: {}]  }
   0x1   :  { %11 = vsyncpa [#allocation6], 0 }
   0x2   :  { %12 = vsyncpa [#allocation4], 0  ;;  %s1388_s18 = smov [#allocation5]   ;;  %s1294_s22 = scalar_lea.hbm %s1532_s1, 256 }
   0x3   :  { %s28_s19 = sshll.u32 %s1388_s18, 4  ;;  %p1295_p0 = scmp.ne.s32.totalorder %s1532_s1, %s1294_s22  ;;  %s29_s19 = int_to_ptr.vmem [resolvable:$true] %s28_s19 }
   0x4   :  { %p1298_p1 = scmp.lt.u32.totalorder %s1294_s22, %s1532_s1 }
   0x6   :  { %p1300_p2 = pnand %p1298_p1, %p1295_p0 }
   0x8   :  { %1303 = shalt.err (!%p1300_p2)
}
   0x9   :  { %s1304_s27 = scalar_lea.vmem %s29_s19, 256  ;;  %p1309_p4 = scmp.lt.s32.totalorder %s29_s19, %s29_s19 }
   0xa   :  { %p1305_p3 = scmp.ne.s32.totalorder %s29_s19, %s1304_s27  ;;  %p1310_p5 = scmp.lt.s32.totalorder %s1304_s27, %s1304_s27 }
   0xc   :  { %p1311_p6 = por %p1310_p5, %p1309_p4 }
   0xe   :  { %p1312_p7 = pnand %p1311_p6, %p1305_p3 }
  0x10   :  { %1315 = shalt.err (!%p1312_p7)
}
  0x11   :  { %s1389_s28 = smov 128   ;;  %s1390_s29 = smov 8  }
  0x12   :  { %34 = dma.hbm_to_vmem [thread:$0]  %s1532_s1, 256, %s29_s19, [#allocation6], %s1389_s28, %s1389_s28, %s1390_s29  }
  0x13   :  { %s1391_s7 = smov [#allocation2]   ;;  %s1392_s9 = smov [#allocation7]  }
  0x14   :  { %s19_s8 = sshll.u32 %s1391_s7, 4  ;;  %s42_s10 = sshll.u32 %s1392_s9, 4  ;;  %s20_s8 = int_to_ptr.vmem [resolvable:$true] %s19_s8  ;;  %s43_s10 = int_to_ptr.vmem [resolvable:$true] %s42_s10 }
  0x15   :  { %s1316_s13 = scalar_lea.hbm %s1531_s0, 128 }
  0x16   :  { %p1317_p8 = scmp.ne.s32.totalorder %s1531_s0, %s1316_s13  ;;  %p1320_p9 = scmp.lt.u32.totalorder %s1316_s13, %s1531_s0 }
  0x18   :  { %p1322_p10 = pnand %p1320_p9, %p1317_p8 }
  0x1a   :  { %1325 = shalt.err (!%p1322_p10)
}
  0x1b   :  { %s1326_s1 = scalar_lea.vmem %s20_s8, 128  ;;  %p1331_p12 = scmp.lt.s32.totalorder %s20_s8, %s20_s8 }
  0x1c   :  { %p1327_p11 = scmp.ne.s32.totalorder %s20_s8, %s1326_s1  ;;  %p1332_p13 = scmp.lt.s32.totalorder %s1326_s1, %s1326_s1 }
  0x1e   :  { %p1333_p0 = por %p1332_p13, %p1331_p12 }
  0x20   :  { %p1334_p1 = pnand %p1333_p0, %p1327_p11 }
  0x22   :  { %1337 = shalt.err (!%p1334_p1)
}
  0x23   :  { %22 = dma.hbm_to_vmem [thread:$0]  %s1531_s0, 128, %s20_s8, [#allocation3]  }
  0x24   :  { %s1338_s22 = scalar_lea.hbm %s1534_s3, 512 }
  0x25   :  { %p1339_p2 = scmp.ne.s32.totalorder %s1534_s3, %s1338_s22  ;;  %p1342_p3 = scmp.lt.u32.totalorder %s1338_s22, %s1534_s3 }
  0x27   :  { %p1344_p4 = pnand %p1342_p3, %p1339_p2 }
  0x29   :  { %1347 = shalt.err (!%p1344_p4)
}
  0x2a   :  { %s1348_s27 = scalar_lea.vmem %s43_s10, 512  ;;  %p1353_p6 = scmp.lt.s32.totalorder %s43_s10, %s43_s10 }
  0x2b   :  { %p1349_p5 = scmp.ne.s32.totalorder %s43_s10, %s1348_s27  ;;  %p1354_p7 = scmp.lt.s32.totalorder %s1348_s27, %s1348_s27 }
  0x2d   :  { %p1355_p8 = por %p1354_p7, %p1353_p6 }
  0x2f   :  { %p1356_p9 = pnand %p1355_p8, %p1349_p5 }
  0x31   :  { %1359 = shalt.err (!%p1356_p9)
}
  0x32   :  { %48 = dma.hbm_to_vmem [thread:$0]  %s1534_s3, 512, %s43_s10, [#allocation6], %s1389_s28, %s1389_s28, %s1390_s29  }
  0x33   :  { %1382 = dma.done.wait [#allocation3], 128  }
  0x34   :  { %1383 = vsyncadd [#allocation3], 4294967168 }
  0x35   :  { %1384 = dma.done.wait [#allocation6], 768  }
  0x36   :  { %1385 = vsyncadd [#allocation6], 4294966528  ;;  %v1393_v0 = vmov 0.0|0.0   ;;  %vm1394_vm0 = vmmov 0   ;;  %v1395_v1 = vmov 0.0   ;;  %vm70_vm1 = vcmask 130048  }
  0x37   :  { %1210 = vmatprep.subr.bf16.mxu0 %v1393_v0  ;;  %1106 = vmatprep.mubr.msk.f32.mxu0 %vm1394_vm0, %v1395_v1  ;;  %v61_v2 = vld [vmem:[#allocation5] sm:$0xff]  ;;  %v62_v3 = vld [vmem:[#allocation5 + $0x8] sm:$0xff]  ;;  %v60_v4 = vld [vmem:[#allocation2] sm:$0xff]  ;;  %vm545_vm2 = vcmask 261120   ;;  %s1396_s6 = smov [#allocation8]  }
  0x38   :  { %1234 = vmatprep.subr.bf16.mxu1 %v1393_v0  ;;  %1163 = vmatprep.mubr.msk.f32.mxu1 %vm1394_vm0, %v1395_v1  ;;  %v75_v5 = vand.u32 4294901760, %v61_v2  ;;  %v78_v6 = vand.u32 4294901760, %v62_v3  ;;  %v72_v7 = vsel %vm70_vm1, %v60_v4, 0  ;;  %v534_v25 = vld [vmem:[#allocation7] sm:$0xff]  ;;  %v535_v26 = vld [vmem:[#allocation7 + $0x8] sm:$0xff]  ;;  %v536_v31 = vld [vmem:[#allocation7 + $0x10] sm:$0xff] }
  0x39   :  { %v141_v8 = vand.u32 4294901760, %v72_v7  ;;  %v550_v27 = vand.u32 4294901760, %v534_v25  ;;  %v553_v28 = vand.u32 4294901760, %v535_v26  ;;  %v537_v32 = vld [vmem:[#allocation7 + $0x18] sm:$0xff]  ;;  %v556_v35 = vand.u32 4294901760, %v536_v31  ;;  %s1042_s7 = sshll.u32 %s1396_s6, 4  ;;  %s1043_s7 = int_to_ptr.vmem [resolvable:$true] %s1042_s7 }
  0x3a   :  { %v1211_v9 = vpack.c.bf16 %v78_v6, %v75_v5  ;;  %v153_v10 = vsub.f32 %v61_v2, %v75_v5  ;;  %v160_v11 = vsub.f32 %v62_v3, %v78_v6  ;;  %v559_v36 = vand.u32 4294901760, %v537_v32  ;;  %v1052_v57 = vld [vmem:[%s1533_s2] ss:$0 sm:$0xff]  ;;  %s1360_s8 = scalar_lea.vmem %s1043_s7, 128  ;;  %p1365_p11 = scmp.lt.s32.totalorder %s1043_s7, %s1043_s7 }
  0x3b   :  { %v142_v12 = vsub.f32 %v72_v7, %v141_v8  ;;  %v630_v29 = vsub.f32 %v534_v25, %v550_v27  ;;  %v637_v30 = vsub.f32 %v535_v26, %v553_v28  ;;  %v644_v39 = vsub.f32 %v536_v31, %v556_v35  ;;  %p1361_p10 = scmp.ne.s32.totalorder %s1043_s7, %s1360_s8  ;;  %p1366_p12 = scmp.lt.s32.totalorder %s1360_s8, %s1360_s8 }
  0x3c   :  { %1212 = vmatpush3.bf16.msra.mxu0 %v1211_v9  ;;  %v154_v13 = vand.u32 4294901760, %v153_v10  ;;  %v161_v14 = vand.u32 4294901760, %v160_v11  ;;  %v1217_v23 = vpack.c.bf16 %v160_v11, %v153_v10  ;;  %v651_v40 = vsub.f32 %v537_v32, %v559_v36 }
  0x3d   :  { %v143_v15 = vand.u32 4294901760, %v142_v12  ;;  %1213 = vmatprep.subr.bf16.mxu0 %v1393_v0  ;;  %v631_v33 = vand.u32 4294901760, %v630_v29  ;;  %v638_v34 = vand.u32 4294901760, %v637_v30  ;;  %v645_v43 = vand.u32 4294901760, %v644_v39  ;;  %p1367_p13 = por %p1366_p12, %p1365_p11 }
  0x3e   :  { %v155_v16 = vsub.f32 %v153_v10, %v154_v13  ;;  %v162_v17 = vsub.f32 %v160_v11, %v161_v14  ;;  %v1223_v24 = vpack.c.bf16 %v161_v14, %v154_v13  ;;  %v652_v44 = vand.u32 4294901760, %v651_v40 }
  0x3f   :  { %v144_v18 = vsub.f32 %v142_v12, %v143_v15  ;;  %v632_v37 = vsub.f32 %v630_v29, %v631_v33  ;;  %v639_v38 = vsub.f32 %v637_v30, %v638_v34  ;;  %v646_v46 = vsub.f32 %v644_v39, %v645_v43  ;;  %p1368_p0 = pnand %p1367_p13, %p1361_p10 }
  0x40   :  { %v156_v19 = vand.u32 4294901760, %v155_v16  ;;  %v163_v20 = vand.u32 4294901760, %v162_v17  ;;  %v653_v47 = vsub.f32 %v651_v40, %v652_v44  ;;  %v1229_v51 = vpack.c.bf16 %v553_v28, %v550_v27 }
  0x41   :  { %v145_v21 = vand.u32 4294901760, %v144_v18  ;;  %v633_v41 = vand.u32 4294901760, %v632_v37  ;;  %v640_v42 = vand.u32 4294901760, %v639_v38  ;;  %v647_v48 = vand.u32 4294901760, %v646_v46 }
  0x42   :  { %v1214_v22 = vpack.c.bf16 %v163_v20, %v156_v19  ;;  %v654_v49 = vand.u32 4294901760, %v653_v47  ;;  %v1241_v52 = vpack.c.bf16 %v637_v30, %v630_v29  ;;  %v1232_v53 = vpack.c.bf16 %v559_v36, %v556_v35 }
  0x43   :  { %1107 = vmatmul.mubr.f32.vlgmr.msra.gmra.mrb[0].mxu0 %v145_v21  ;;  %v1235_v45 = vpack.c.bf16 %v640_v42, %v633_v41  ;;  %v1244_v54 = vpack.c.bf16 %v651_v40, %v644_v39  ;;  %v1253_v55 = vpack.c.bf16 %v638_v34, %v631_v33  ;;  %v1256_v56 = vpack.c.bf16 %v652_v44, %v645_v43 }
  0x44   :  { %1215 = vmatpush3.bf16.msra.mxu0 %v1214_v22  ;;  %1113 = vmatprep.mubr.msk.f32.mxu0 %vm1394_vm0, %v1395_v1  ;;  %v1238_v50 = vpack.c.bf16 %v654_v49, %v647_v48 }
  0x45   :  { %1216 = vmatprep.subr.bf16.mxu0 %v1393_v0  ;;  %1236 = vmatpush3.bf16.msra.mxu1 %v1235_v45 }
  0x46   :  { %1237 = vmatprep.subr.bf16.mxu1 %v1393_v0 }
  0x49   :  { %1239 = vmatpush3.bf16.msra.mxu1 %v1238_v50 }
  0x4a   :  { %1240 = vmatprep.subr.bf16.mxu1 %v1393_v0 }
  0x4b   :  { %1114 = vmatmul.mubr.f32.vlgmr.msra.gmra.mrb[0].mxu0 %v141_v8 }
  0x4c   :  { %1218 = vmatpush3.bf16.msra.mxu0 %v1217_v23  ;;  %1120 = vmatprep.mubr.msk.f32.mxu0 %vm1394_vm0, %v1395_v1 }
  0x4d   :  { %1219 = vmatprep.subr.bf16.mxu0 %v1393_v0 }
  0x53   :  { %1121 = vmatmul.mubr.f32.vlgmr.msra.gmra.mrb[0].mxu0 %v142_v12 }
  0x54   :  { %1221 = vmatpush3.bf16.msra.mxu0 %v1211_v9  ;;  %1127 = vmatprep.mubr.msk.f32.mxu0 %vm1394_vm0, %v1395_v1 }
  0x55   :  { %1222 = vmatprep.subr.bf16.mxu0 %v1393_v0 }
  0x5b   :  { %1128 = vmatmul.mubr.f32.vlgmr.msra.gmra.mrb[0].mxu0 %v143_v15 }
  0x5c   :  { %1224 = vmatpush3.bf16.msra.mxu0 %v1223_v24  ;;  %1134 = vmatprep.mubr.msk.f32.mxu0 %vm1394_vm0, %v1395_v1 }
  0x5d   :  { %1225 = vmatprep.subr.bf16.mxu0 %v1393_v0 }
  0x63   :  { %1135 = vmatmul.mubr.f32.vlgmr.msra.gmra.mrb[0].mxu0 %v141_v8 }
  0x64   :  { %1227 = vmatpush3.bf16.msra.mxu0 %v1211_v9  ;;  %1141 = vmatprep.mubr.msk.f32.mxu0 %vm1394_vm0, %v1395_v1 }
  0x65   :  { %1228 = vmatprep.subr.bf16.mxu0 %v1393_v0 }
  0x6b   :  { %1142 = vmatmul.mubr.f32.vlgmr.msra.gmra.mrb[0].mxu0 %v141_v8  ;;  %v1053_v8 = vld [vmem:[%s1535_s4] ss:$0 sm:$0xff] }
  0x6c   :  { %1152 = vmatprep.mubr.msk.f32.mxu0 %vm1394_vm0, %v1395_v1  ;;  %1230 = vmatpush3.bf16.msra.mxu0 %v1229_v51 }
  0x6d   :  { %1231 = vmatprep.subr.bf16.mxu0 %v1393_v0 }
  0x70   :  { %1233 = vmatpush3.bf16.msra.mxu0 %v1232_v53 }
 0x13e   :  { %v529_v58 = vpop.f32.mrb[0].mxu0 }
 0x13f   :  { %v1264_v59 = vadd.f32 %v1052_v57, %v529_v58  ;;  %v1143_v60 = vpop.f32.mrb[1].mxu0 }
 0x141   :  { %v533_v61 = vmax.f32 %v1264_v59, 0.0 }
 0x143   :  { %v547_v62 = vsel %vm545_vm2, %v533_v61, 0 }
 0x144   :  { %v618_v63 = vand.u32 4294901760, %v547_v62 }
 0x146   :  { %v619_v2 = vsub.f32 %v547_v62, %v618_v63  ;;  %1164 = vmatmul.mubr.f32.vlgmr.msra.gmra.mrb[0].mxu1 %v618_v63 }
 0x147   :  { %1242 = vmatpush3.bf16.msra.mxu1 %v1241_v52  ;;  %1174 = vmatprep.mubr.msk.f32.mxu1 %vm1394_vm0, %v1395_v1 }
 0x148   :  { %v620_v3 = vand.u32 4294901760, %v619_v2  ;;  %1243 = vmatprep.subr.bf16.mxu1 %v1393_v0 }
 0x14a   :  { %v621_v4 = vsub.f32 %v619_v2, %v620_v3 }
 0x14b   :  { %1245 = vmatpush3.bf16.msra.mxu1 %v1244_v54 }
 0x14c   :  { %v622_v5 = vand.u32 4294901760, %v621_v4  ;;  %1246 = vmatprep.subr.bf16.mxu1 %v1393_v0 }
 0x14e   :  { %1153 = vmatmul.mubr.f32.vlgmr.msra.gmra.mrb[2].mxu0 %v622_v5  ;;  %1175 = vmatmul.mubr.f32.vlgmr.msra.gmra.mrb[0].mxu1 %v619_v2 }
 0x14f   :  { %1248 = vmatpush3.bf16.msra.mxu1 %v1229_v51  ;;  %1185 = vmatprep.mubr.msk.f32.mxu1 %vm1394_vm0, %v1395_v1 }
 0x150   :  { %1249 = vmatprep.subr.bf16.mxu1 %v1393_v0 }
 0x153   :  { %1251 = vmatpush3.bf16.msra.mxu1 %v1232_v53 }
 0x154   :  { %1252 = vmatprep.subr.bf16.mxu1 %v1393_v0 }
 0x156   :  { %1186 = vmatmul.mubr.f32.vlgmr.msra.gmra.mrb[0].mxu1 %v620_v3 }
 0x157   :  { %1254 = vmatpush3.bf16.msra.mxu1 %v1253_v55  ;;  %1196 = vmatprep.mubr.msk.f32.mxu1 %vm1394_vm0, %v1395_v1 }
 0x158   :  { %1255 = vmatprep.subr.bf16.mxu1 %v1393_v0 }
 0x15b   :  { %1257 = vmatpush3.bf16.msra.mxu1 %v1256_v56 }
 0x15c   :  { %1258 = vmatprep.subr.bf16.mxu1 %v1393_v0 }
 0x15e   :  { %1197 = vmatmul.mubr.f32.vlgmr.msra.gmra.mrb[0].mxu1 %v618_v63 }
 0x15f   :  { %1260 = vmatpush3.bf16.msra.mxu1 %v1229_v51  ;;  %1207 = vmatprep.mubr.msk.f32.mxu1 %vm1394_vm0, %v1395_v1 }
 0x160   :  { %1261 = vmatprep.subr.bf16.mxu1 %v1393_v0 }
 0x163   :  { %1263 = vmatpush3.bf16.msra.mxu1 %v1232_v53 }
 0x166   :  { %1208 = vmatmul.mubr.f32.vlgmr.msra.gmra.mrb[0].mxu1 %v618_v63 }
 0x221   :  { %v624_v6 = vpop.f32.mrb[2].mxu0 }
 0x222   :  { %v1154_v7 = vpop.f32.mrb[3].mxu0  ;;  %v625_v9 = vadd.f32 %v1053_v8, %v624_v6 }
 0x239   :  { %v1030_v10 = vpop.f32.mrb[0].mxu1 }
 0x23a   :  { %v1266_v11 = vadd.f32 %v1030_v10, %v625_v9  ;;  %v1209_v12 = vpop.f32.mrb[1].mxu1 }
 0x23c   :  { %v1034_v13 = vmax.f32 %v1266_v11, 0.0 }
 0x23e   :  { %1035 = vst.msk [vmem:[#allocation8] sm:$0xff] %vm545_vm2, %v1034_v13 }
 0x23f   :  { %1371 = shalt.err (!%p1368_p0)
}
 0x240   :  { %s1372_s4 = scalar_lea.hbm %s1536_s5, 128 }
 0x241   :  { %p1373_p1 = scmp.ne.s32.totalorder %s1536_s5, %s1372_s4  ;;  %p1376_p2 = scmp.lt.u32.totalorder %s1372_s4, %s1536_s5 }
 0x243   :  { %p1378_p3 = pnand %p1376_p2, %p1373_p1 }
 0x245   :  { %1381 = shalt.err (!%p1378_p3)
}
 0x246   :  { %1045 = dma.vmem_to_hbm [thread:$0]  %s1043_s7, 128, %s1536_s5, [#allocation4]  }
 0x247   :  { %1386 = dma.done.wait [#allocation4], 128  }
 0x248   :  { %1387 = vsyncadd [#allocation4], 4294967168 }
 0x249   :  { %1049 = vsyncpa [#allocation3], 1 }
 0x24a   :  { %1050 = vsyncpa [#allocation6], 1 }
 0x24b   :  { %1051 = vsyncpa [#allocation4], 1 }

// kernel: tpu_custom_call.1
= control target key start
LH: loop header
LB: loop body
LE: loop exit
PB: predicated region body
PF: predicated region fallthrough
CT: control target
= control target key end

     0   :  { %10 = vsyncpa [#allocation3], 0  ;;  %s1531_s0 = inlined_call_operand.hbm [shape: f32[8,16], index: 0, kind: input, shape index: {}]   ;;  %s1532_s1 = inlined_call_operand.hbm [shape: f32[16,32], index: 1, kind: input, shape index: {}]   ;;  %s1533_s2 = inlined_call_operand.vmem [shape: f32[1,32], index: 2, kind: input, shape index: {}]   ;;  %s1534_s3 = inlined_call_operand.hbm [shape: f32[32,32], index: 3, kind: input, shape index: {}]   ;;  %s1535_s4 = inlined_call_operand.vmem [shape: f32[1,32], index: 4, kind: input, shape index: {}]   ;;  %s1536_s5 = inlined_call_operand.hbm [shape: f32[8,32], index: 5, kind: output, shape index: {}]  }
   0x1   :  { %11 = vsyncpa [#allocation6], 0 }
   0x2   :  { %12 = vsyncpa [#allocation4], 0  ;;  %s1388_s18 = smov [#allocation5]   ;;  %s1294_s22 = scalar_lea.hbm %s1532_s1, 256 }
   0x3   :  { %s28_s19 = sshll.u32 %s1388_s18, 4  ;;  %p1295_p0 = scmp.ne.s32.totalorder %s1532_s1, %s1294_s22  ;;  %s29_s19 = int_to_ptr.vmem [resolvable:$true] %s28_s19 }
   0x4   :  { %p1298_p1 = scmp.lt.u32.totalorder %s1294_s22, %s1532_s1 }
   0x6   :  { %p1300_p2 = pnand %p1298_p1, %p1295_p0 }
   0x8   :  { %1303 = shalt.err (!%p1300_p2)
}
   0x9   :  { %s1304_s27 = scalar_lea.vmem %s29_s19, 256  ;;  %p1309_p4 = scmp.lt.s32.totalorder %s29_s19, %s29_s19 }
   0xa   :  { %p1305_p3 = scmp.ne.s32.totalorder %s29_s19, %s1304_s27  ;;  %p1310_p5 = scmp.lt.s32.totalorder %s1304_s27, %s1304_s27 }
   0xc   :  { %p1311_p6 = por %p1310_p5, %p1309_p4 }
   0xe   :  { %p1312_p7 = pnand %p1311_p6, %p1305_p3 }
  0x10   :  { %1315 = shalt.err (!%p1312_p7)
}
  0x11   :  { %s1389_s28 = smov 128   ;;  %s1390_s29 = smov 8  }
  0x12   :  { %34 = dma.hbm_to_vmem [thread:$0]  %s1532_s1, 256, %s29_s19, [#allocation6], %s1389_s28, %s1389_s28, %s1390_s29  }
  0x13   :  { %s1391_s7 = smov [#allocation2]   ;;  %s1392_s9 = smov [#allocation7]  }
  0x14   :  { %s19_s8 = sshll.u32 %s1391_s7, 4  ;;  %s42_s10 = sshll.u32 %s1392_s9, 4  ;;  %s20_s8 = int_to_ptr.vmem [resolvable:$true] %s19_s8  ;;  %s43_s10 = int_to_ptr.vmem [resolvable:$true] %s42_s10 }
  0x15   :  { %s1316_s13 = scalar_lea.hbm %s1531_s0, 128 }
  0x16   :  { %p1317_p8 = scmp.ne.s32.totalorder %s1531_s0, %s1316_s13  ;;  %p1320_p9 = scmp.lt.u32.totalorder %s1316_s13, %s1531_s0 }
  0x18   :  { %p1322_p10 = pnand %p1320_p9, %p1317_p8 }
  0x1a   :  { %1325 = shalt.err (!%p1322_p10)
}
  0x1b   :  { %s1326_s1 = scalar_lea.vmem %s20_s8, 128  ;;  %p1331_p12 = scmp.lt.s32.totalorder %s20_s8, %s20_s8 }
  0x1c   :  { %p1327_p11 = scmp.ne.s32.totalorder %s20_s8, %s1326_s1  ;;  %p1332_p13 = scmp.lt.s32.totalorder %s1326_s1, %s1326_s1 }
  0x1e   :  { %p1333_p0 = por %p1332_p13, %p1331_p12 }
  0x20   :  { %p1334_p1 = pnand %p1333_p0, %p1327_p11 }
  0x22   :  { %1337 = shalt.err (!%p1334_p1)
}
  0x23   :  { %22 = dma.hbm_to_vmem [thread:$0]  %s1531_s0, 128, %s20_s8, [#allocation3]  }
  0x24   :  { %s1338_s22 = scalar_lea.hbm %s1534_s3, 512 }
  0x25   :  { %p1339_p2 = scmp.ne.s32.totalorder %s1534_s3, %s1338_s22  ;;  %p1342_p3 = scmp.lt.u32.totalorder %s1338_s22, %s1534_s3 }
  0x27   :  { %p1344_p4 = pnand %p1342_p3, %p1339_p2 }
  0x29   :  { %1347 = shalt.err (!%p1344_p4)
}
  0x2a   :  { %s1348_s27 = scalar_lea.vmem %s43_s10, 512  ;;  %p1353_p6 = scmp.lt.s32.totalorder %s43_s10, %s43_s10 }
  0x2b   :  { %p1349_p5 = scmp.ne.s32.totalorder %s43_s10, %s1348_s27  ;;  %p1354_p7 = scmp.lt.s32.totalorder %s1348_s27, %s1348_s27 }
  0x2d   :  { %p1355_p8 = por %p1354_p7, %p1353_p6 }
  0x2f   :  { %p1356_p9 = pnand %p1355_p8, %p1349_p5 }
  0x31   :  { %1359 = shalt.err (!%p1356_p9)
}
  0x32   :  { %48 = dma.hbm_to_vmem [thread:$0]  %s1534_s3, 512, %s43_s10, [#allocation6], %s1389_s28, %s1389_s28, %s1390_s29  }
  0x33   :  { %1382 = dma.done.wait [#allocation3], 128  }
  0x34   :  { %1383 = vsyncadd [#allocation3], 4294967168 }
  0x35   :  { %1384 = dma.done.wait [#allocation6], 768  }
  0x36   :  { %1385 = vsyncadd [#allocation6], 4294966528  ;;  %v1393_v0 = vmov 0.0|0.0   ;;  %vm1394_vm0 = vmmov 0   ;;  %v1395_v1 = vmov 0.0   ;;  %vm70_vm1 = vcmask 130048  }
  0x37   :  { %1210 = vmatprep.subr.bf16.mxu0 %v1393_v0  ;;  %1106 = vmatprep.mubr.msk.f32.mxu0 %vm1394_vm0, %v1395_v1  ;;  %v61_v2 = vld [vmem:[#allocation5] sm:$0xff]  ;;  %v62_v3 = vld [vmem:[#allocation5 + $0x8] sm:$0xff]  ;;  %v60_v4 = vld [vmem:[#allocation2] sm:$0xff]  ;;  %vm545_vm2 = vcmask 261120   ;;  %s1396_s6 = smov [#allocation8]  }
  0x38   :  { %1234 = vmatprep.subr.bf16.mxu1 %v1393_v0  ;;  %1163 = vmatprep.mubr.msk.f32.mxu1 %vm1394_vm0, %v1395_v1  ;;  %v75_v5 = vand.u32 4294901760, %v61_v2  ;;  %v78_v6 = vand.u32 4294901760, %v62_v3  ;;  %v72_v7 = vsel %vm70_vm1, %v60_v4, 0  ;;  %v534_v25 = vld [vmem:[#allocation7] sm:$0xff]  ;;  %v535_v26 = vld [vmem:[#allocation7 + $0x8] sm:$0xff]  ;;  %v536_v31 = vld [vmem:[#allocation7 + $0x10] sm:$0xff] }
  0x39   :  { %v141_v8 = vand.u32 4294901760, %v72_v7  ;;  %v550_v27 = vand.u32 4294901760, %v534_v25  ;;  %v553_v28 = vand.u32 4294901760, %v535_v26  ;;  %v537_v32 = vld [vmem:[#allocation7 + $0x18] sm:$0xff]  ;;  %v556_v35 = vand.u32 4294901760, %v536_v31  ;;  %s1042_s7 = sshll.u32 %s1396_s6, 4  ;;  %s1043_s7 = int_to_ptr.vmem [resolvable:$true] %s1042_s7 }
  0x3a   :  { %v1211_v9 = vpack.c.bf16 %v78_v6, %v75_v5  ;;  %v153_v10 = vsub.f32 %v61_v2, %v75_v5  ;;  %v160_v11 = vsub.f32 %v62_v3, %v78_v6  ;;  %v559_v36 = vand.u32 4294901760, %v537_v32  ;;  %v1052_v57 = vld [vmem:[%s1533_s2] ss:$0 sm:$0xff]  ;;  %s1360_s8 = scalar_lea.vmem %s1043_s7, 128  ;;  %p1365_p11 = scmp.lt.s32.totalorder %s1043_s7, %s1043_s7 }
  0x3b   :  { %v142_v12 = vsub.f32 %v72_v7, %v141_v8  ;;  %v630_v29 = vsub.f32 %v534_v25, %v550_v27  ;;  %v637_v30 = vsub.f32 %v535_v26, %v553_v28  ;;  %v644_v39 = vsub.f32 %v536_v31, %v556_v35  ;;  %p1361_p10 = scmp.ne.s32.totalorder %s1043_s7, %s1360_s8  ;;  %p1366_p12 = scmp.lt.s32.totalorder %s1360_s8, %s1360_s8 }
  0x3c   :  { %1212 = vmatpush3.bf16.msra.mxu0 %v1211_v9  ;;  %v154_v13 = vand.u32 4294901760, %v153_v10  ;;  %v161_v14 = vand.u32 4294901760, %v160_v11  ;;  %v1217_v23 = vpack.c.bf16 %v160_v11, %v153_v10  ;;  %v651_v40 = vsub.f32 %v537_v32, %v559_v36 }
  0x3d   :  { %v143_v15 = vand.u32 4294901760, %v142_v12  ;;  %1213 = vmatprep.subr.bf16.mxu0 %v1393_v0  ;;  %v631_v33 = vand.u32 4294901760, %v630_v29  ;;  %v638_v34 = vand.u32 4294901760, %v637_v30  ;;  %v645_v43 = vand.u32 4294901760, %v644_v39  ;;  %p1367_p13 = por %p1366_p12, %p1365_p11 }
  0x3e   :  { %v155_v16 = vsub.f32 %v153_v10, %v154_v13  ;;  %v162_v17 = vsub.f32 %v160_v11, %v161_v14  ;;  %v1223_v24 = vpack.c.bf16 %v161_v14, %v154_v13  ;;  %v652_v44 = vand.u32 4294901760, %v651_v40 }
  0x3f   :  { %v144_v18 = vsub.f32 %v142_v12, %v143_v15  ;;  %v632_v37 = vsub.f32 %v630_v29, %v631_v33  ;;  %v639_v38 = vsub.f32 %v637_v30, %v638_v34  ;;  %v646_v46 = vsub.f32 %v644_v39, %v645_v43  ;;  %p1368_p0 = pnand %p1367_p13, %p1361_p10 }
  0x40   :  { %v156_v19 = vand.u32 4294901760, %v155_v16  ;;  %v163_v20 = vand.u32 4294901760, %v162_v17  ;;  %v653_v47 = vsub.f32 %v651_v40, %v652_v44  ;;  %v1229_v51 = vpack.c.bf16 %v553_v28, %v550_v27 }
  0x41   :  { %v145_v21 = vand.u32 4294901760, %v144_v18  ;;  %v633_v41 = vand.u32 4294901760, %v632_v37  ;;  %v640_v42 = vand.u32 4294901760, %v639_v38  ;;  %v647_v48 = vand.u32 4294901760, %v646_v46 }
  0x42   :  { %v1214_v22 = vpack.c.bf16 %v163_v20, %v156_v19  ;;  %v654_v49 = vand.u32 4294901760, %v653_v47  ;;  %v1241_v52 = vpack.c.bf16 %v637_v30, %v630_v29  ;;  %v1232_v53 = vpack.c.bf16 %v559_v36, %v556_v35 }
  0x43   :  { %1107 = vmatmul.mubr.f32.vlgmr.msra.gmra.mrb[0].mxu0 %v145_v21  ;;  %v1235_v45 = vpack.c.bf16 %v640_v42, %v633_v41  ;;  %v1244_v54 = vpack.c.bf16 %v651_v40, %v644_v39  ;;  %v1253_v55 = vpack.c.bf16 %v638_v34, %v631_v33  ;;  %v1256_v56 = vpack.c.bf16 %v652_v44, %v645_v43 }
  0x44   :  { %1215 = vmatpush3.bf16.msra.mxu0 %v1214_v22  ;;  %1113 = vmatprep.mubr.msk.f32.mxu0 %vm1394_vm0, %v1395_v1  ;;  %v1238_v50 = vpack.c.bf16 %v654_v49, %v647_v48 }
  0x45   :  { %1216 = vmatprep.subr.bf16.mxu0 %v1393_v0  ;;  %1236 = vmatpush3.bf16.msra.mxu1 %v1235_v45 }
  0x46   :  { %1237 = vmatprep.subr.bf16.mxu1 %v1393_v0 }
  0x49   :  { %1239 = vmatpush3.bf16.msra.mxu1 %v1238_v50 }
  0x4a   :  { %1240 = vmatprep.subr.bf16.mxu1 %v1393_v0 }
  0x4b   :  { %1114 = vmatmul.mubr.f32.vlgmr.msra.gmra.mrb[0].mxu0 %v141_v8 }
  0x4c   :  { %1218 = vmatpush3.bf16.msra.mxu0 %v1217_v23  ;;  %1120 = vmatprep.mubr.msk.f32.mxu0 %vm1394_vm0, %v1395_v1 }
  0x4d   :  { %1219 = vmatprep.subr.bf16.mxu0 %v1393_v0 }
  0x53   :  { %1121 = vmatmul.mubr.f32.vlgmr.msra.gmra.mrb[0].mxu0 %v142_v12 }
  0x54   :  { %1221 = vmatpush3.bf16.msra.mxu0 %v1211_v9  ;;  %1127 = vmatprep.mubr.msk.f32.mxu0 %vm1394_vm0, %v1395_v1 }
  0x55   :  { %1222 = vmatprep.subr.bf16.mxu0 %v1393_v0 }
  0x5b   :  { %1128 = vmatmul.mubr.f32.vlgmr.msra.gmra.mrb[0].mxu0 %v143_v15 }
  0x5c   :  { %1224 = vmatpush3.bf16.msra.mxu0 %v1223_v24  ;;  %1134 = vmatprep.mubr.msk.f32.mxu0 %vm1394_vm0, %v1395_v1 }
  0x5d   :  { %1225 = vmatprep.subr.bf16.mxu0 %v1393_v0 }
  0x63   :  { %1135 = vmatmul.mubr.f32.vlgmr.msra.gmra.mrb[0].mxu0 %v141_v8 }
  0x64   :  { %1227 = vmatpush3.bf16.msra.mxu0 %v1211_v9  ;;  %1141 = vmatprep.mubr.msk.f32.mxu0 %vm1394_vm0, %v1395_v1 }
  0x65   :  { %1228 = vmatprep.subr.bf16.mxu0 %v1393_v0 }
  0x6b   :  { %1142 = vmatmul.mubr.f32.vlgmr.msra.gmra.mrb[0].mxu0 %v141_v8  ;;  %v1053_v8 = vld [vmem:[%s1535_s4] ss:$0 sm:$0xff] }
  0x6c   :  { %1152 = vmatprep.mubr.msk.f32.mxu0 %vm1394_vm0, %v1395_v1  ;;  %1230 = vmatpush3.bf16.msra.mxu0 %v1229_v51 }
  0x6d   :  { %1231 = vmatprep.subr.bf16.mxu0 %v1393_v0 }
  0x70   :  { %1233 = vmatpush3.bf16.msra.mxu0 %v1232_v53 }
 0x13e   :  { %v529_v58 = vpop.f32.mrb[0].mxu0 }
 0x13f   :  { %v1264_v59 = vadd.f32 %v1052_v57, %v529_v58  ;;  %v1143_v60 = vpop.f32.mrb[1].mxu0 }
 0x141   :  { %v533_v61 = vmax.f32 %v1264_v59, 0.0 }
 0x143   :  { %v547_v62 = vsel %vm545_vm2, %v533_v61, 0 }
 0x144   :  { %v618_v63 = vand.u32 4294901760, %v547_v62 }
 0x146   :  { %v619_v2 = vsub.f32 %v547_v62, %v618_v63  ;;  %1164 = vmatmul.mubr.f32.vlgmr.msra.gmra.mrb[0].mxu1 %v618_v63 }
 0x147   :  { %1242 = vmatpush3.bf16.msra.mxu1 %v1241_v52  ;;  %1174 = vmatprep.mubr.msk.f32.mxu1 %vm1394_vm0, %v1395_v1 }
 0x148   :  { %v620_v3 = vand.u32 4294901760, %v619_v2  ;;  %1243 = vmatprep.subr.bf16.mxu1 %v1393_v0 }
 0x14a   :  { %v621_v4 = vsub.f32 %v619_v2, %v620_v3 }
 0x14b   :  { %1245 = vmatpush3.bf16.msra.mxu1 %v1244_v54 }
 0x14c   :  { %v622_v5 = vand.u32 4294901760, %v621_v4  ;;  %1246 = vmatprep.subr.bf16.mxu1 %v1393_v0 }
 0x14e   :  { %1153 = vmatmul.mubr.f32.vlgmr.msra.gmra.mrb[2].mxu0 %v622_v5  ;;  %1175 = vmatmul.mubr.f32.vlgmr.msra.gmra.mrb[0].mxu1 %v619_v2 }
 0x14f   :  { %1248 = vmatpush3.bf16.msra.mxu1 %v1229_v51  ;;  %1185 = vmatprep.mubr.msk.f32.mxu1 %vm1394_vm0, %v1395_v1 }
 0x150   :  { %1249 = vmatprep.subr.bf16.mxu1 %v1393_v0 }
 0x153   :  { %1251 = vmatpush3.bf16.msra.mxu1 %v1232_v53 }
 0x154   :  { %1252 = vmatprep.subr.bf16.mxu1 %v1393_v0 }
 0x156   :  { %1186 = vmatmul.mubr.f32.vlgmr.msra.gmra.mrb[0].mxu1 %v620_v3 }
 0x157   :  { %1254 = vmatpush3.bf16.msra.mxu1 %v1253_v55  ;;  %1196 = vmatprep.mubr.msk.f32.mxu1 %vm1394_vm0, %v1395_v1 }
 0x158   :  { %1255 = vmatprep.subr.bf16.mxu1 %v1393_v0 }
 0x15b   :  { %1257 = vmatpush3.bf16.msra.mxu1 %v1256_v56 }
 0x15c   :  { %1258 = vmatprep.subr.bf16.mxu1 %v1393_v0 }
 0x15e   :  { %1197 = vmatmul.mubr.f32.vlgmr.msra.gmra.mrb[0].mxu1 %v618_v63 }
 0x15f   :  { %1260 = vmatpush3.bf16.msra.mxu1 %v1229_v51  ;;  %1207 = vmatprep.mubr.msk.f32.mxu1 %vm1394_vm0, %v1395_v1 }
 0x160   :  { %1261 = vmatprep.subr.bf16.mxu1 %v1393_v0 }
 0x163   :  { %1263 = vmatpush3.bf16.msra.mxu1 %v1232_v53 }
 0x166   :  { %1208 = vmatmul.mubr.f32.vlgmr.msra.gmra.mrb[0].mxu1 %v618_v63 }
 0x221   :  { %v624_v6 = vpop.f32.mrb[2].mxu0 }
 0x222   :  { %v1154_v7 = vpop.f32.mrb[3].mxu0  ;;  %v625_v9 = vadd.f32 %v1053_v8, %v624_v6 }
 0x239   :  { %v1030_v10 = vpop.f32.mrb[0].mxu1 }
 0x23a   :  { %v1266_v11 = vadd.f32 %v1030_v10, %v625_v9  ;;  %v1209_v12 = vpop.f32.mrb[1].mxu1 }
 0x23c   :  { %v1034_v13 = vmax.f32 %v1266_v11, 0.0 }
 0x23e   :  { %1035 = vst.msk [vmem:[#allocation8] sm:$0xff] %vm545_vm2, %v1034_v13 }
 0x23f   :  { %1371 = shalt.err (!%p1368_p0)
}
 0x240   :  { %s1372_s4 = scalar_lea.hbm %s1536_s5, 128 }
 0x241   :  { %p1373_p1 = scmp.ne.s32.totalorder %s1536_s5, %s1372_s4  ;;  %p1376_p2 = scmp.lt.u32.totalorder %s1372_s4, %s1536_s5 }
 0x243   :  { %p1378_p3 = pnand %p1376_p2, %p1373_p1 }
 0x245   :  { %1381 = shalt.err (!%p1378_p3)
}
 0x246   :  { %1045 = dma.vmem_to_hbm [thread:$0]  %s1043_s7, 128, %s1536_s5, [#allocation4]  }
 0x247   :  { %1386 = dma.done.wait [#allocation4], 128  }
 0x248   :  { %1387 = vsyncadd [#allocation4], 4294967168 }
 0x249   :  { %1049 = vsyncpa [#allocation3], 1 }
 0x24a   :  { %1050 = vsyncpa [#allocation6], 1 }
 0x24b   :  { %1051 = vsyncpa [#allocation4], 1 }

</bundles_post_ra>
